<compile_context>
chip_gen: v5e
topology: v5e:2x2
jax: 0.10.0
libtpu: 0.0.40
codegen_flags: <defaults>
</compile_context>

<pallas_src>
import jax
import jax.numpy as jnp
from jax.experimental import pallas as pl
from jax.experimental.pallas import tpu as pltpu


def _fused_transpose_add_scale_kernel(x_ref, o_ref):
    # x_ref: (N, C, HW)   o_ref: (C, N, HW)
    # v1 = x + 8 ; clamp_min(4) then clamp_max(v1) cancel exactly ; v5 = v1 / 4
    # with the transpose(0, 1) folded into the store (leading axes only).
    y = (x_ref[...] + 8.0) * 0.25
    o_ref[...] = jnp.transpose(y, (1, 0, 2))


def model_forward(x1):
    """x1: (N, C, H, W) float32. Returns (C, N, H, W) float32."""
    N, C, H, W = x1.shape
    HW = H * W
    # Lane-dense presentation: flatten spatial dims onto the lane axis.
    x_flat = x1.reshape(N, C, HW)
    out_flat = pl.pallas_call(
        _fused_transpose_add_scale_kernel,
        out_shape=jax.ShapeDtypeStruct((C, N, HW), x1.dtype),
        grid=(1,),
        in_specs=[pl.BlockSpec((N, C, HW), lambda i: (0, 0, 0))],
        out_specs=pl.BlockSpec((C, N, HW), lambda i: (0, 0, 0)),
        compiler_params=pltpu.CompilerParams(
            dimension_semantics=("arbitrary",)
        ),
    )(x_flat)
    return out_flat.reshape(C, N, H, W)


def _reference(x1):
    # Faithful op-by-op reference of the PyTorch module.
    v1 = x1 + 8.0
    v2 = jnp.transpose(v1, (1, 0, 2, 3))
    v3 = jnp.maximum(v2, 4.0)
    v4 = jnp.minimum(v3, v2)
    return v4 / 4.0


if __name__ == "__main__":
    key = jax.random.PRNGKey(0)
    x1 = jax.random.normal(key, (3, 4, 5, 5), dtype=jnp.float32)

    out = jax.block_until_ready(model_forward(x1))

    ref = _reference(x1)
    assert out.shape == (4, 3, 5, 5), out.shape
    assert jnp.allclose(out, ref, atol=1e-6, rtol=1e-6), "mismatch vs reference"

    print("KERNEL_OK")
</pallas_src>

<mosaic_0001>
module attributes {stable_mosaic.version = 11 : i64} {
  func.func @_fused_transpose_add_scale_kernel(%arg0: i32, %arg1: memref<3x4x25xf32, #tpu.memory_space<vmem>>, %arg2: memref<4x3x25xf32, #tpu.memory_space<vmem>>) attributes {dimension_semantics = [#tpu.dimension_semantics<arbitrary>], iteration_bounds = array<i64: 1>, scalar_prefetch = 0 : i64, scratch_operands = 0 : i64, tpu.core_type = #tpu.core_type<tc>, window_params = [{pipeline_mode = #tpu.pipeline_mode<synchronous>, transform_indices = @transform_0, window_bounds = array<i64: 3, 4, 25>}, {pipeline_mode = #tpu.pipeline_mode<synchronous>, transform_indices = @transform_1, window_bounds = array<i64: 4, 3, 25>}]} {
    %c0 = arith.constant 0 : index
    %c0_0 = arith.constant 0 : index
    %c0_1 = arith.constant 0 : index
    %0 = vector.load %arg1[%c0, %c0_0, %c0_1] : memref<3x4x25xf32, #tpu.memory_space<vmem>>, vector<3x4x25xf32>
    %cst = arith.constant 8.000000e+00 : f32
    %1 = vector.broadcast %cst : f32 to vector<3x4x25xf32>
    %2 = arith.addf %0, %1 : vector<3x4x25xf32>
    %cst_2 = arith.constant 2.500000e-01 : f32
    %3 = vector.broadcast %cst_2 : f32 to vector<3x4x25xf32>
    %4 = arith.mulf %2, %3 : vector<3x4x25xf32>
    %5 = tpu.transpose %4, [1, 0, 2] : vector<3x4x25xf32> -> vector<4x3x25xf32>
    %c0_3 = arith.constant 0 : index
    %c0_4 = arith.constant 0 : index
    %c0_5 = arith.constant 0 : index
    %6 = vector.load %arg2[%c0_3, %c0_4, %c0_5] : memref<4x3x25xf32, #tpu.memory_space<vmem>>, vector<4x3x25xf32>
    tpu.vector_store %arg2[%c0_3, %c0_4, %c0_5], %5 {strides = array<i32>} : memref<4x3x25xf32, #tpu.memory_space<vmem>>, vector<4x3x25xf32>,
    return
  }
  func.func @transform_0(%arg0: i32) -> (i32, i32, i32) {
    %c0_i32 = arith.constant 0 : i32
    %c0_i32_0 = arith.constant 0 : i32
    %c0_i32_1 = arith.constant 0 : i32
    %c0_i32_2 = arith.constant 0 : i32
    return %c0_i32, %c0_i32_0, %c0_i32_1 : i32, i32, i32
  }
  func.func @transform_1(%arg0: i32) -> (i32, i32, i32) {
    %c0_i32 = arith.constant 0 : i32
    %c0_i32_0 = arith.constant 0 : i32
    %c0_i32_1 = arith.constant 0 : i32
    %c0_i32_2 = arith.constant 0 : i32
    return %c0_i32, %c0_i32_0, %c0_i32_1 : i32, i32, i32
  }
}

</mosaic_0001>

<bundles_post_ra>
// kernel: tpu_custom_call.1
= control target key start
LH: loop header
LB: loop body
LE: loop exit
PB: predicated region body
PF: predicated region fallthrough
CT: control target
= control target key end

     0   :  { %6 = vsyncpa [#allocation3], 0  ;;  %s101_s9 = smov [#allocation2]   ;;  %s102_s11 = smov 64   ;;  %s136_s0 = inlined_call_operand.hbm [shape: f32[3,4,25], index: 0, kind: input, shape index: {}]   ;;  %s137_s1 = inlined_call_operand.vmem [shape: f32[4,3,25], index: 1, kind: output, shape index: {}]  }
   0x1   :  { %s11_s8 = sshll.u32 %s136_s0, 4  ;;  %s13_s10 = sshll.u32 %s101_s9, 4  ;;  %s12_s8 = int_to_ptr.hbm [resolvable:$true] %s11_s8  ;;  %s14_s10 = int_to_ptr.vmem [resolvable:$true] %s13_s10 }
   0x2   :  { %s103_s12 = smov 4  }
   0x3   :  { %19 = dma.hbm_to_vmem [thread:$0]  %s12_s8, 192, %s14_s10, [#allocation3], %s102_s11, %s102_s11, %s103_s12  }
   0x4   :  { %99 = dma.done.wait [#allocation3], 192  }
   0x5   :  { %100 = vsyncadd [#allocation3], 4294967104  ;;  %v104_v0 = vmov 1983009808   ;;  %v24_v2 = vld [vmem:[#allocation2] sm:$0xf] }
   0x6   :  { %v36_v1 = vunpack.c.l.s4 %v104_v0  ;;  %v25_v3 = vld [vmem:[#allocation2 + $0x4] sm:$0xf]  ;;  %v26_v4 = vld [vmem:[#allocation2 + $0x8] sm:$0xf]  ;;  %v27_v5 = vadd.f32 8.0, %v24_v2  ;;  %vm33_vm0 = vcmask 1047556  }
   0x7   :  { %v28_v6 = vadd.f32 8.0, %v25_v3  ;;  %v29_v7 = vadd.f32 8.0, %v26_v4  ;;  %v105_v12 = vmov 1934713408   ;;  %vm60_vm1 = vcmask 198656  }
   0x8   :  { %v37_v8 = vunpack.c.0.s8 %v36_v1  ;;  %v30_v9 = vmul.f32 0.25, %v27_v5  ;;  %v49_v13 = vunpack.c.l.s4 %v105_v12 }
   0x9   :  { %v31_v10 = vmul.f32 0.25, %v29_v7  ;;  %v39_v11 = vmul.f32 0.25, %v28_v6 }
   0xa   :  { %v50_v18 = vunpack.c.0.s8 %v49_v13 }
   0xb   :  { %v32_v14 = vrot.slane %v31_v10, 4  ;;  %v43_v15 = vperm.slane %v39_v11, %v37_v8 }
   0xd   :  { %v34_v16 = vsel %vm33_vm0, %v32_v14, %v30_v9  ;;  %v44_v17 = vrot.slane %v43_v15, 4 }
   0xe   :  { %v38_v19 = vperm.slane %v34_v16, %v37_v8 }
  0x10   :  { %v45_v20 = vsel %vm33_vm0, %v44_v17, %v38_v19  ;;  %v46_v21 = vrot.slane %v38_v19, 4 }
  0x11   :  { %v51_v22 = vperm.slane %v45_v20, %v50_v18 }
  0x12   :  { %v47_v23 = vsel %vm33_vm0, %v43_v15, %v46_v21 }
  0x13   :  { %61 = vst.msk [vmem:[%s137_s1] sm:$0x7] %vm60_vm1, %v51_v22  ;;  %v56_v24 = vrot.slane %v51_v22, 4  ;;  %v55_v25 = vperm.slane %v47_v23, %v50_v18 }
  0x15   :  { %v57_v26 = vsel %vm33_vm0, 0.0, %v56_v24  ;;  %63 = vst.msk [vmem:[%s137_s1 + $0x8] sm:$0x7] %vm60_vm1, %v55_v25  ;;  %v58_v27 = vrot.slane %v55_v25, 4 }
  0x16   :  { %62 = vst.msk [vmem:[%s137_s1 + $0x4] sm:$0x7] %vm60_vm1, %v57_v26 }
  0x17   :  { %v59_v28 = vsel %vm33_vm0, 0.0, %v58_v27 }
  0x18   :  { %64 = vst.msk [vmem:[%s137_s1 + $0xc] sm:$0x7] %vm60_vm1, %v59_v28 }
  0x19   :  { %69 = vsyncpa [#allocation3], 1 }

</bundles_post_ra>
